<compile_context>
chip_gen: v7x
topology: tpu7x:2x2x1
jax: 0.10.0
libtpu: 0.0.40
codegen_flags: <defaults>
</compile_context>

<pallas_src>
import functools

import jax
import jax.numpy as jnp
from jax import lax
from jax.experimental import pallas as pl
from jax.experimental.pallas import tpu as pltpu


def _vq_kernel(e_sq_ref, e_ref, et_ref, z_ref, zq_ref, idx_ref, err_ref):
    # e_sq_ref: (K, 1)            precomputed |e_k|^2 (hoisted out of the loop)
    # e_ref   : (K, D)            codebook
    # et_ref  : (D, K)            codebook, pre-transposed (for the gather matmul)
    # z_ref   : (1, D, T)         channel-major latent slab, T spatial positions
    # zq_ref  : (1, D, T)         quantized latents, same layout (no transposes)
    # idx_ref : (1, 1, 1, T)      selected codebook indices (lane-dense store)
    # err_ref : (1, 1, 1, T)      per-token sum_d (z_q - z)^2 (loss partials)
    zt = z_ref[0].astype(jnp.float32)          # (D, T)
    e = e_ref[...].astype(jnp.float32)         # (K, D)
    et = et_ref[...].astype(jnp.float32)       # (D, K)
    e_sq = e_sq_ref[...]                       # (K, 1)
    k_sz = e.shape[0]

    # cross[k, t] = e_k . z_t  (MXU, D-deep contraction, standard orientation)
    cross = lax.dot_general(e, zt, (((1,), (0,)), ((), ())),
                            preferred_element_type=jnp.float32)       # (K, T)

    # argmin_k |z_t - e_k|^2 == argmin_k (|e_k|^2 - 2 e_k.z_t); the |z_t|^2 term
    # is constant per token, so it is dropped (saves a VPU mul + XLU reduce).
    dist = e_sq - 2.0 * cross                                          # (K, T)
    min_d = jnp.min(dist, axis=0, keepdims=True)                       # (1, T)
    row = lax.broadcasted_iota(jnp.int32, dist.shape, 0)
    # first-index tie-break (matches torch.argmin convention)
    idx = jnp.min(jnp.where(dist == min_d, row, jnp.int32(k_sz)), axis=0)  # (T,)

    # Exact codebook "gather" via one-hot matmul (MXU, K-deep contraction).
    onehot = (row == idx[None, :]).astype(jnp.float32)                 # (K, T)
    zq = lax.dot_general(et, onehot, (((1,), (0,)), ((), ())),
                         preferred_element_type=jnp.float32)           # (D, T)

    zq_ref[...] = zq[None].astype(zq_ref.dtype)
    idx_ref[...] = idx.reshape(idx_ref.shape).astype(jnp.int32)
    err_ref[...] = jnp.sum((zq - zt) ** 2, axis=0).reshape(err_ref.shape)


def _pick_tile_hw(hw, max_tile):
    """Largest lane-aligned tile of spatial positions that divides H*W."""
    if hw <= max_tile:
        return hw
    start = (max_tile // 128) * 128
    for t in range(start, 0, -128):
        if hw % t == 0:
            return t
    return hw  # no lane-aligned divisor: fall back to one tile per batch element


@functools.partial(jax.jit, static_argnames=("max_tile_hw",))
def vector_quantizer_forward(z_nchw, embedding, kl_scale=10.0, max_tile_hw=2048):
    """Pallas implementation of VectorQuantizer.forward.

    Args:
      z_nchw:    (B, C=D, H, W) float latent (PyTorch NCHW convention).
      embedding: (K, D) float codebook.

    Returns:
      (z_q_nchw, vq_loss, indices) with the same forward values as the PyTorch
      module (straight-through / .detach() only affect gradients, not values).
    """
    B, C, H, W = z_nchw.shape
    K, D = embedding.shape
    assert C == D, "channel dim must equal embedding_dim"
    HW = H * W

    tile_hw = _pick_tile_hw(HW, max_tile_hw)
    n_tiles = HW // tile_hw

    # Free reshape (no transpose): tokens are the columns of each (D, HW) slab.
    z_r = z_nchw.reshape(B, D, HW).astype(jnp.float32)
    e = embedding.astype(jnp.float32)
    e_t = e.T                                             # (D, K), tiny, one-time
    e_sq = jnp.sum(e * e, axis=1, keepdims=True)          # (K, 1), hoisted

    # NOTE: assumes the codebook and (K, tile_hw) intermediates fit in VMEM;
    # for very large K the codebook axis would also need tiling.
    grid = (B, n_tiles)

    zq_r, idx_blk, err_blk = pl.pallas_call(
        _vq_kernel,
        out_shape=(
            jax.ShapeDtypeStruct((B, D, HW), jnp.float32),
            jax.ShapeDtypeStruct((B, n_tiles, 1, tile_hw), jnp.int32),
            jax.ShapeDtypeStruct((B, n_tiles, 1, tile_hw), jnp.float32),
        ),
        grid_spec=pltpu.PrefetchScalarGridSpec(
            num_scalar_prefetch=0,
            grid=grid,
            in_specs=[
                pl.BlockSpec((K, 1), lambda b, t: (0, 0)),            # |E|^2
                pl.BlockSpec((K, D), lambda b, t: (0, 0)),            # E
                pl.BlockSpec((D, K), lambda b, t: (0, 0)),            # E^T
                pl.BlockSpec((1, D, tile_hw), lambda b, t: (b, 0, t)),  # z slab
            ],
            out_specs=[
                pl.BlockSpec((1, D, tile_hw), lambda b, t: (b, 0, t)),       # z_q
                pl.BlockSpec((1, 1, 1, tile_hw), lambda b, t: (b, t, 0, 0)),  # idx
                pl.BlockSpec((1, 1, 1, tile_hw), lambda b, t: (b, t, 0, 0)),  # err
            ],
        ),
        compiler_params=pltpu.CompilerParams(
            dimension_semantics=("parallel", "parallel"),
            vmem_limit_bytes=32 * 1024 * 1024,
        ),
    )(e_sq, e, e_t, z_r)

    # Straight-through estimator: forward value of z + (z_q - z).detach() is z_q.
    z_q_nchw = zq_r.reshape(B, D, H, W)
    indices = idx_blk.reshape(B, HW)

    # vq_loss = mean((z_q - z)^2) + kl_scale * mean((z_q - z)^2)
    msq = jnp.sum(err_blk) / jnp.float32(B * HW * D)
    vq_loss = msq + kl_scale * msq
    return z_q_nchw, vq_loss, indices


def _reference_forward(z_nchw, embedding, kl_scale=10.0):
    """Pure-JAX reference mirroring the PyTorch forward, for sanity checking."""
    B, C, H, W = z_nchw.shape
    K, D = embedding.shape
    z = jnp.transpose(z_nchw, (0, 2, 3, 1))
    flat_z = z.reshape(-1, D)
    dist = (jnp.sum(flat_z ** 2, axis=1, keepdims=True)
            + jnp.sum(embedding ** 2, axis=1)
            - 2.0 * flat_z @ embedding.T)
    idx = jnp.argmin(dist, axis=1)
    z_q = embedding[idx].reshape(z.shape)
    vq_loss = jnp.mean((z_q - z) ** 2 + kl_scale * jnp.mean((z_q - z) ** 2))
    z_q = jnp.transpose(z_q, (0, 3, 1, 2))
    return z_q, vq_loss, idx.reshape(B, -1), dist


if __name__ == "__main__":
    # Module config (synthetic, deterministic init per nn.Embedding uniform init)
    n_embedding = 128          # codebook size K
    embedding_dim = 32         # latent channels D
    B, H, W = 2, 16, 16

    key = jax.random.PRNGKey(0)
    k_z, k_e = jax.random.split(key)

    z = jax.random.normal(k_z, (B, embedding_dim, H, W), dtype=jnp.float32)
    embedding = jax.random.uniform(
        k_e, (n_embedding, embedding_dim),
        minval=-1.0 / n_embedding, maxval=1.0 / n_embedding,
        dtype=jnp.float32)

    z_q, vq_loss, indices = vector_quantizer_forward(z, embedding)
    jax.block_until_ready((z_q, vq_loss, indices))

    # --- checks (tie-robust: a near-degenerate argmin tie may legitimately
    #     resolve to a different-but-equally-close code than torch.argmin) ---
    z_q_ref, vq_loss_ref, idx_ref, dist_ref = _reference_forward(z, embedding)

    assert z_q.shape == (B, embedding_dim, H, W)
    assert indices.shape == (B, H * W)

    flat_idx = indices.reshape(-1)
    flat_zq = jnp.transpose(z_q, (0, 2, 3, 1)).reshape(-1, embedding_dim)

    # 1) quantized vectors are (numerically) exactly the selected codebook rows
    assert jnp.allclose(flat_zq, embedding[flat_idx], atol=2e-5, rtol=2e-5)
    # 2) selected codes achieve the minimum distance (up to float noise)
    chosen = jnp.take_along_axis(dist_ref, flat_idx[:, None], axis=1)[:, 0]
    assert jnp.all(chosen <= jnp.min(dist_ref, axis=1) + 1e-3)
    # 3) loss matches the PyTorch formula's value
    assert jnp.allclose(vq_loss, vq_loss_ref, atol=1e-5, rtol=1e-4)

    print("KERNEL_OK")
</pallas_src>

<mosaic_0001>
module attributes {stable_mosaic.version = 11 : i64} {
  func.func @_vq_kernel(%arg0: i32, %arg1: i32, %arg2: memref<128x1xf32, #tpu.memory_space<vmem>>, %arg3: memref<128x32xf32, #tpu.memory_space<vmem>>, %arg4: memref<32x128xf32, #tpu.memory_space<vmem>>, %arg5: memref<1x32x256xf32, #tpu.memory_space<vmem>>, %arg6: memref<1x32x256xf32, #tpu.memory_space<vmem>>, %arg7: memref<1x1x1x256xi32, #tpu.memory_space<vmem>>, %arg8: memref<1x1x1x256xf32, #tpu.memory_space<vmem>>) attributes {dimension_semantics = [#tpu.dimension_semantics<parallel>, #tpu.dimension_semantics<parallel>], iteration_bounds = array<i64: 2, 1>, scalar_prefetch = 0 : i64, scratch_operands = 0 : i64, tpu.core_type = #tpu.core_type<tc>, window_params = [{pipeline_mode = #tpu.pipeline_mode<synchronous>, transform_indices = @transform_0, window_bounds = array<i64: 128, 1>}, {pipeline_mode = #tpu.pipeline_mode<synchronous>, transform_indices = @transform_1, window_bounds = array<i64: 128, 32>}, {pipeline_mode = #tpu.pipeline_mode<synchronous>, transform_indices = @transform_2, window_bounds = array<i64: 32, 128>}, {transform_indices = @transform_3, window_bounds = array<i64: 1, 32, 256>}, {transform_indices = @transform_4, window_bounds = array<i64: 1, 32, 256>}, {transform_indices = @transform_5, window_bounds = array<i64: 1, 1, 1, 256>}, {transform_indices = @transform_6, window_bounds = array<i64: 1, 1, 1, 256>}]} {
    %c0 = arith.constant 0 : index
    %c0_0 = arith.constant 0 : index
    %c0_1 = arith.constant 0 : index
    %0 = vector.load %arg5[%c0, %c0_0, %c0_1] : memref<1x32x256xf32, #tpu.memory_space<vmem>>, vector<1x32x256xf32>
    %1 = vector.shape_cast %0 : vector<1x32x256xf32> to vector<32x256xf32>
    %c0_2 = arith.constant 0 : index
    %c0_3 = arith.constant 0 : index
    %2 = vector.load %arg3[%c0_2, %c0_3] : memref<128x32xf32, #tpu.memory_space<vmem>>, vector<128x32xf32>
    %c0_4 = arith.constant 0 : index
    %c0_5 = arith.constant 0 : index
    %3 = vector.load %arg4[%c0_4, %c0_5] : memref<32x128xf32, #tpu.memory_space<vmem>>, vector<32x128xf32>
    %c0_6 = arith.constant 0 : index
    %c0_7 = arith.constant 0 : index
    %4 = vector.load %arg2[%c0_6, %c0_7] : memref<128x1xf32, #tpu.memory_space<vmem>>, vector<128x1xf32>
    %cst = arith.constant dense<0.000000e+00> : vector<128x256xf32>
    %5 = tpu.matmul %2, %1, %cst {dimension_numbers = #tpu.dot_dimension_numbers<[1], [0], [0], [1], [0, 0, 1, 1], [], []>} : vector<128x32xf32>, vector<32x256xf32>, vector<128x256xf32> -> vector<128x256xf32>
    %cst_8 = arith.constant 2.000000e+00 : f32
    %6 = vector.broadcast %cst_8 : f32 to vector<128x256xf32>
    %7 = arith.mulf %6, %5 : vector<128x256xf32>
    %8 = vector.broadcast %4 : vector<128x1xf32> to vector<128x256xf32>
    %9 = arith.subf %8, %7 : vector<128x256xf32>
    %cst_9 = arith.constant dense<0x7F800000> : vector<256xf32>
    %10 = vector.multi_reduction <minimumf>, %9, %cst_9 [0] : vector<128x256xf32> to vector<256xf32>
    %11 = vector.shape_cast %10 : vector<256xf32> to vector<1x256xf32>
    %12 = tpu.iota {dimensions = array<i32: 0>} : vector<128x256xi32>
    %13 = vector.broadcast %11 : vector<1x256xf32> to vector<128x256xf32>
    %14 = arith.cmpf oeq, %9, %13 : vector<128x256xf32>
    %c128_i32 = arith.constant 128 : i32
    %15 = vector.broadcast %c128_i32 : i32 to vector<128x256xi32>
    %16 = arith.select %14, %12, %15 : vector<128x256xi1>, vector<128x256xi32>
    %cst_10 = arith.constant dense<2147483647> : vector<256xi32>
    %17 = vector.multi_reduction <minsi>, %16, %cst_10 [0] : vector<128x256xi32> to vector<256xi32>
    %18 = vector.shape_cast %17 : vector<256xi32> to vector<1x256xi32>
    %19 = vector.broadcast %18 : vector<1x256xi32> to vector<128x256xi32>
    %20 = arith.cmpi eq, %12, %19 : vector<128x256xi32>
    %21 = arith.extui %20 : vector<128x256xi1> to vector<128x256xi32>
    %22 = arith.sitofp %21 : vector<128x256xi32> to vector<128x256xf32>
    %cst_11 = arith.constant dense<0.000000e+00> : vector<32x256xf32>
    %23 = tpu.matmul %3, %22, %cst_11 {dimension_numbers = #tpu.dot_dimension_numbers<[1], [0], [0], [1], [0, 0, 1, 1], [], []>} : vector<32x128xf32>, vector<128x256xf32>, vector<32x256xf32> -> vector<32x256xf32>
    %24 = vector.shape_cast %23 : vector<32x256xf32> to vector<1x32x256xf32>
    %c0_12 = arith.constant 0 : index
    %c0_13 = arith.constant 0 : index
    %c0_14 = arith.constant 0 : index
    %25 = vector.load %arg6[%c0_12, %c0_13, %c0_14] : memref<1x32x256xf32, #tpu.memory_space<vmem>>, vector<1x32x256xf32>
    tpu.vector_store %arg6[%c0_12, %c0_13, %c0_14], %24 {strides = array<i32>} : memref<1x32x256xf32, #tpu.memory_space<vmem>>, vector<1x32x256xf32>,
    %26 = vector.shape_cast %17 : vector<256xi32> to vector<1x1x1x256xi32>
    %c0_15 = arith.constant 0 : index
    %c0_16 = arith.constant 0 : index
    %c0_17 = arith.constant 0 : index
    %c0_18 = arith.constant 0 : index
    %27 = vector.load %arg7[%c0_15, %c0_16, %c0_17, %c0_18] : memref<1x1x1x256xi32, #tpu.memory_space<vmem>>, vector<1x1x1x256xi32>
    tpu.vector_store %arg7[%c0_15, %c0_16, %c0_17, %c0_18], %26 {strides = array<i32>} : memref<1x1x1x256xi32, #tpu.memory_space<vmem>>, vector<1x1x1x256xi32>,
    %28 = arith.subf %23, %1 : vector<32x256xf32>
    %29 = arith.mulf %28, %28 : vector<32x256xf32>
    %cst_19 = arith.constant dense<0.000000e+00> : vector<256xf32>
    %30 = vector.multi_reduction <add>, %29, %cst_19 [0] : vector<32x256xf32> to vector<256xf32>
    %31 = vector.shape_cast %30 : vector<256xf32> to vector<1x1x1x256xf32>
    %c0_20 = arith.constant 0 : index
    %c0_21 = arith.constant 0 : index
    %c0_22 = arith.constant 0 : index
    %c0_23 = arith.constant 0 : index
    %32 = vector.load %arg8[%c0_20, %c0_21, %c0_22, %c0_23] : memref<1x1x1x256xf32, #tpu.memory_space<vmem>>, vector<1x1x1x256xf32>
    tpu.vector_store %arg8[%c0_20, %c0_21, %c0_22, %c0_23], %31 {strides = array<i32>} : memref<1x1x1x256xf32, #tpu.memory_space<vmem>>, vector<1x1x1x256xf32>,
    return
  }
  func.func @transform_0(%arg0: i32, %arg1: i32) -> (i32, i32) {
    %c0_i32 = arith.constant 0 : i32
    %c0_i32_0 = arith.constant 0 : i32
    %c0_i32_1 = arith.constant 0 : i32
    return %c0_i32, %c0_i32_0 : i32, i32
  }
  func.func @transform_1(%arg0: i32, %arg1: i32) -> (i32, i32) {
    %c0_i32 = arith.constant 0 : i32
    %c0_i32_0 = arith.constant 0 : i32
    %c0_i32_1 = arith.constant 0 : i32
    return %c0_i32, %c0_i32_0 : i32, i32
  }
  func.func @transform_2(%arg0: i32, %arg1: i32) -> (i32, i32) {
    %c0_i32 = arith.constant 0 : i32
    %c0_i32_0 = arith.constant 0 : i32
    %c0_i32_1 = arith.constant 0 : i32
    return %c0_i32, %c0_i32_0 : i32, i32
  }
  func.func @transform_3(%arg0: i32, %arg1: i32) -> (i32, i32, i32) {
    %c0_i32 = arith.constant 0 : i32
    %c0_i32_0 = arith.constant 0 : i32
    return %arg0, %c0_i32, %arg1 : i32, i32, i32
  }
  func.func @transform_4(%arg0: i32, %arg1: i32) -> (i32, i32, i32) {
    %c0_i32 = arith.constant 0 : i32
    %c0_i32_0 = arith.constant 0 : i32
    return %arg0, %c0_i32, %arg1 : i32, i32, i32
  }
  func.func @transform_5(%arg0: i32, %arg1: i32) -> (i32, i32, i32, i32) {
    %c0_i32 = arith.constant 0 : i32
    %c0_i32_0 = arith.constant 0 : i32
    %c0_i32_1 = arith.constant 0 : i32
    return %arg0, %arg1, %c0_i32, %c0_i32_0 : i32, i32, i32, i32
  }
  func.func @transform_6(%arg0: i32, %arg1: i32) -> (i32, i32, i32, i32) {
    %c0_i32 = arith.constant 0 : i32
    %c0_i32_0 = arith.constant 0 : i32
    %c0_i32_1 = arith.constant 0 : i32
    return %arg0, %arg1, %c0_i32, %c0_i32_0 : i32, i32, i32, i32
  }
}

</mosaic_0001>

<bundles_post_ra>
// kernel: vector_quantizer_forward.1
= control target key start
LH: loop header
LB: loop body
LE: loop exit
PB: predicated region body
PF: predicated region fallthrough
CT: control target
= control target key end

     0   :  { %s1609_s21 = smov 0   ;;  %s1611_s22 = smov 0   ;;  %s2289_s0 = inlined_call_operand.vmem [shape: f32[128,1], index: 0, kind: input, shape index: {}]   ;;  %s2290_s1 = inlined_call_operand.vmem [shape: f32[128,32], index: 1, kind: input, shape index: {}]   ;;  %s2291_s2 = inlined_call_operand.vmem [shape: f32[32,128], index: 2, kind: input, shape index: {}]   ;;  %s2292_s3 = inlined_call_operand.vmem [shape: f32[2,32,256], index: 3, kind: input, shape index: {}]   ;;  %s2293_s4 = inlined_call_operand.vmem [shape: f32[2,32,256], index: 4, kind: output, shape index: {0}]   ;;  %s2294_s5 = inlined_call_operand.vmem [shape: s32[2,1,1,256], index: 5, kind: output, shape index: {1}]   ;;  %s2295_s6 = inlined_call_operand.vmem [shape: f32[2,1,1,256], index: 6, kind: output, shape index: {2}]  }
   0x1   :  { %s1613_s23 = smov 0  }
   0x2 LB: > { %s29_s24 = sadd.s32 1, %s1564_s22  ;;  %p1382_p0 = scmp.ge.s32.totalorder %s1568_s23, 1  ;;  %s1568_s23 = sphi %s1613_s23, %s17_s23   ;;  %s1564_s22 = sphi %s1611_s22, %s2307_s22   ;;  %s1560_s21 = sphi %s1609_s21, %s2306_s21  }
   0x3   : > { %p31_p1 = scmp.ge.s32.totalorder %s29_s24, 2  ;;  %p242_p2 = scmp.lt.s32.totalorder %s1568_s23, 3 }
   0x5   : > { %s2309_s24 = smov (%p31_p1, %s29_s24), 0  ;;  %p243_p3 = pnand %p1382_p0, %p242_p2 }
   0x6   : > { %p297_p4 = scmp.lt.s32.totalorder (!%p243_p3), %s1560_s21, 1  ;;  %v1570_v0 = vmov (!%p243_p3), 0.0   ;;  %v1571_v1 = vmov (!%p243_p3), 0   ;;  %v360_v2 = vld [vmem:[%s2289_s0] sm:$0xff] (!%p243_p3)  ;;  %v361_v3 = vld [vmem:[%s2289_s0 + $0x8] sm:$0xff] (!%p243_p3)  ;;  %v362_v15 = vld [vmem:[%s2289_s0 + $0x10] sm:$0xff] (!%p243_p3) }
   0x7   : > { %246 = sbr.rel (%p243_p3) target bundleno = 652 (0x28c), region = 36  ;;  %489 = vmatprep.mubr.f32.mxu0 (!%p243_p3), %v1570_v0  ;;  %1091 = vmatprep.mubr.f32.mxu1 (!%p243_p3), %v1570_v0  ;;  %v363_v17 = vld [vmem:[%s2289_s0 + $0x18] sm:$0xff] (!%p243_p3)  ;;  %v364_v18 = vld [vmem:[%s2289_s0 + $0x20] sm:$0xff] (!%p243_p3)  ;;  %vm376_vm0 = vcmask (!%p243_p3), 261120   ;;  %v365_v20 = vld [vmem:[%s2289_s0 + $0x28] sm:$0xff] (!%p243_p3) }
   0x8   : > { %1541 = vset.pattern.permute.xlu0 (!%p243_p3), %v1571_v1  ;;  %1542 = vset.pattern.permute.xlu1 (!%p243_p3), %v1571_v1  ;;  %v340_v19 = vld [vmem:[%s2290_s1] sm:$0xff] (!%p243_p3)  ;;  %v366_v21 = vld [vmem:[%s2289_s0 + $0x30] sm:$0xff] (!%p243_p3)  ;;  %v341_v22 = vld [vmem:[%s2290_s1 + $0x8] sm:$0xff] (!%p243_p3) }
   0x9   : > { %620 = vperm.xlu0 (!%p243_p3), %1541, %v360_v2   ;;  %630 = vperm.xlu1 (!%p243_p3), %1542, %v362_v15   ;;  %v367_v23 = vld [vmem:[%s2289_s0 + $0x38] sm:$0xff] (!%p243_p3)  ;;  %v368_v24 = vld [vmem:[%s2289_s0 + $0x40] sm:$0xff] (!%p243_p3)  ;;  %v342_v25 = vld [vmem:[%s2290_s1 + $0x10] sm:$0xff] (!%p243_p3) }
   0xa   : > { %v369_v26 = vld [vmem:[%s2289_s0 + $0x48] sm:$0xff] (!%p243_p3)  ;;  %v370_v27 = vld [vmem:[%s2289_s0 + $0x50] sm:$0xff] (!%p243_p3)  ;;  %v343_v28 = vld [vmem:[%s2290_s1 + $0x18] sm:$0xff] (!%p243_p3) }
   0xb   : > { %v371_v29 = vld [vmem:[%s2289_s0 + $0x58] sm:$0xff] (!%p243_p3)  ;;  %v372_v30 = vld [vmem:[%s2289_s0 + $0x60] sm:$0xff] (!%p243_p3)  ;;  %v373_v32 = vld [vmem:[%s2289_s0 + $0x68] sm:$0xff] (!%p243_p3) }
   0xc   : > { %v344_v31 = vld [vmem:[%s2290_s1 + $0x20] sm:$0xff] (!%p243_p3)  ;;  %v374_v33 = vld [vmem:[%s2289_s0 + $0x70] sm:$0xff] (!%p243_p3)  ;;  %v345_v34 = vld [vmem:[%s2290_s1 + $0x28] sm:$0xff] (!%p243_p3) }
   0xd   : > { %625 = vperm.xlu0 (!%p243_p3), %1541, %v361_v3   ;;  %635 = vperm.xlu1 (!%p243_p3), %1542, %v363_v17   ;;  %v375_v35 = vld [vmem:[%s2289_s0 + $0x78] sm:$0xff] (!%p243_p3)  ;;  %v346_v36 = vld [vmem:[%s2290_s1 + $0x30] sm:$0xff] (!%p243_p3)  ;;  %v348_v38 = vld [vmem:[%s2290_s1 + $0x40] sm:$0xff] (!%p243_p3) }
   0xe   : > { %s2311_s21 = smov (!%p297_p4, %s1560_s21), 1  ;;  %v347_v37 = vld [vmem:[%s2290_s1 + $0x38] sm:$0xff]  ;;  %v349_v39 = vld [vmem:[%s2290_s1 + $0x48] sm:$0xff]  ;;  %v350_v40 = vld [vmem:[%s2290_s1 + $0x50] sm:$0xff] }
   0xf   : > { %s1471_s25 = sshll.u32 %s2311_s21, 6  ;;  %v351_v41 = vld [vmem:[%s2290_s1 + $0x58] sm:$0xff]  ;;  %v352_v42 = vld [vmem:[%s2290_s1 + $0x60] sm:$0xff]  ;;  %v353_v43 = vld [vmem:[%s2290_s1 + $0x68] sm:$0xff]  ;;  %s1387_s15 = sshll.u32 %s2311_s21, 1 }
  0x10   : > { %s1637_s28 = scalar_lea.vmem %s2292_s3, %s1471_s25  ;;  %v354_v44 = vld [vmem:[%s2290_s1 + $0x70] sm:$0xff]  ;;  %v355_v45 = vld [vmem:[%s2290_s1 + $0x78] sm:$0xff]  ;;  %s323_s18 = scalar_lea.vmem %s2294_s5, %s1387_s15 }
  0x11   : > { %v1646_v4 = vld [vmem:[%s1637_s28 + $0x8] sm:$0xff]  ;;  %v1649_v5 = vld [vmem:[%s1637_s28 + $0x18] sm:$0xff]  ;;  %v1652_v6 = vld [vmem:[%s1637_s28] sm:$0xff]  ;;  %640 = vperm.xlu0 %1541, %v364_v18   ;;  %645 = vperm.xlu1 %1542, %v365_v20   ;;  %s2253_s11 = scalar_lea.vmem %s2293_s4, %s1471_s25  ;;  %s331_s12 = scalar_lea.vmem %s2295_s6, %s1387_s15 }
  0x12   : > { %v1473_v7 = vpack.c.bf16 %v1649_v5, %v1646_v4  ;;  %v1657_v8 = vld [vmem:[%s1637_s28 + $0x10] sm:$0xff]  ;;  %v337_v9 = vld [vmem:[%s1637_s28 + $0x28] sm:$0xff]  ;;  %v339_v10 = vld [vmem:[%s1637_s28 + $0x38] sm:$0xff] }
  0x13   : > { %v1475_v11 = vpack.c.bf16 %v1657_v8, %v1652_v6  ;;  %v1477_v12 = vpack.c.bf16 %v339_v10, %v337_v9  ;;  %v1664_v13 = vld [vmem:[%s1637_s28 + $0x20] sm:$0xff]  ;;  %v338_v14 = vld [vmem:[%s1637_s28 + $0x30] sm:$0xff] }
  0x14   : > { %1474 = vmatprep.subr.bf16.mxu0 %v1473_v7  ;;  %v1479_v16 = vpack.c.bf16 %v338_v14, %v1664_v13 }
  0x15   : > { %1476 = vmatpush1.bf16.msra.mxu0 %v1475_v11  ;;  %650 = vperm.xlu0 %1541, %v366_v21  }
  0x16   : > { %1478 = vmatprep.subr.bf16.mxu0 %v1477_v12  ;;  %655 = vperm.xlu1 %1542, %v367_v23  }
  0x19   : > { %1480 = vmatpush1.bf16.msra.mxu0 %v1479_v16  ;;  %660 = vperm.xlu0 %1541, %v368_v24  }
  0x1a   : > { %665 = vperm.xlu1 %1542, %v369_v26  }
  0x1c   : > { %1389 = vmatmul.mubr.msk.f32.vlgmr.msra.gmra.mrb[0].mxu0 %vm376_vm0, %v340_v19 }
  0x1d   : > { %495 = vmatprep.mubr.f32.mxu0 %v1570_v0  ;;  %670 = vperm.xlu0 %1541, %v370_v27  }
  0x1e   : > { %675 = vperm.xlu1 %1542, %v371_v29  }
  0x20   : > { %1390 = vmatmul.mubr.msk.f32.gmra.mrb[2].mxu0 %vm376_vm0, %v341_v22 }
  0x21   : > { %501 = vmatprep.mubr.f32.mxu0 %v1570_v0  ;;  %680 = vperm.xlu0 %1541, %v372_v30  }
  0x22   : > { %685 = vperm.xlu1 %1542, %v373_v32  }
  0x24   : > { %1391 = vmatmul.mubr.msk.f32.gmra.mrb[4].mxu0 %vm376_vm0, %v342_v25 }
  0x25   : > { %507 = vmatprep.mubr.f32.mxu0 %v1570_v0  ;;  %690 = vperm.xlu0 %1541, %v374_v33  }
  0x26   : > { %695 = vperm.xlu1 %1542, %v375_v35  }
  0x28   : > { %1392 = vmatmul.mubr.msk.f32.gmra.mrb[6].mxu0 %vm376_vm0, %v343_v28 }
  0x29   : > { %513 = vmatprep.mubr.f32.mxu0 %v1570_v0 }
  0x2c   : > { %1393 = vmatmul.mubr.msk.f32.gmra.mrb[8].mxu0 %vm376_vm0, %v344_v31 }
  0x2d   : > { %519 = vmatprep.mubr.f32.mxu0 %v1570_v0 }
  0x30   : > { %1394 = vmatmul.mubr.msk.f32.gmra.mrb[10].mxu0 %vm376_vm0, %v345_v34 }
  0x31   : > { %525 = vmatprep.mubr.f32.mxu0 %v1570_v0 }
  0x34   : > { %1395 = vmatmul.mubr.msk.f32.gmra.mrb[12].mxu0 %vm376_vm0, %v346_v36 }
  0x35   : > { %531 = vmatprep.mubr.f32.mxu0 %v1570_v0 }
  0x38   : > { %1396 = vmatmul.mubr.msk.f32.gmra.mrb[14].mxu0 %vm376_vm0, %v347_v37 }
  0x39   : > { %537 = vmatprep.mubr.f32.mxu0 %v1570_v0 }
  0x3c   : > { %1397 = vmatmul.mubr.msk.f32.gmra.mrb[16].mxu0 %vm376_vm0, %v348_v38 }
  0x3d   : > { %543 = vmatprep.mubr.f32.mxu0 %v1570_v0 }
  0x40   : > { %1398 = vmatmul.mubr.msk.f32.gmra.mrb[18].mxu0 %vm376_vm0, %v349_v39 }
  0x41   : > { %549 = vmatprep.mubr.f32.mxu0 %v1570_v0 }
  0x44   : > { %1399 = vmatmul.mubr.msk.f32.gmra.mrb[20].mxu0 %vm376_vm0, %v350_v40 }
  0x45   : > { %555 = vmatprep.mubr.f32.mxu0 %v1570_v0 }
  0x48   : > { %1400 = vmatmul.mubr.msk.f32.gmra.mrb[22].mxu0 %vm376_vm0, %v351_v41 }
  0x49   : > { %561 = vmatprep.mubr.f32.mxu0 %v1570_v0 }
  0x4c   : > { %1401 = vmatmul.mubr.msk.f32.gmra.mrb[24].mxu0 %vm376_vm0, %v352_v42 }
  0x4d   : > { %567 = vmatprep.mubr.f32.mxu0 %v1570_v0 }
  0x50   : > { %1402 = vmatmul.mubr.msk.f32.gmra.mrb[26].mxu0 %vm376_vm0, %v353_v43 }
  0x51   : > { %573 = vmatprep.mubr.f32.mxu0 %v1570_v0 }
  0x54   : > { %1403 = vmatmul.mubr.msk.f32.gmra.mrb[28].mxu0 %vm376_vm0, %v354_v44 }
  0x55   : > { %579 = vmatprep.mubr.f32.mxu0 %v1570_v0 }
  0x58   : > { %1404 = vmatmul.mubr.msk.f32.gmra.mrb[30].mxu0 %vm376_vm0, %v355_v45 }
  0x88   : > { %v621_v50 = vpop.permute.xlu0 %620  ;;  %v631_v53 = vpop.permute.xlu1 %630 }
  0x8c   : > { %v626_v63 = vpop.permute.xlu0 %625  ;;  %v636_v11 = vpop.permute.xlu1 %635 }
  0x90   : > { %v641_v23 = vpop.permute.xlu0 %640  ;;  %v646_v31 = vpop.permute.xlu1 %645 }
  0x94   : > { %v651_v40 = vpop.permute.xlu0 %650 }
  0xef   : > { %v491_v46 = vpop.f32.mrb[0].mxu0 }
  0xf0   : > { %v493_v47 = vpop.f32.mrb[1].mxu0  ;;  %v586_v51 = vmul.f32 2.0, %v491_v46 }
  0xf1   : > { %v587_v52 = vmul.f32 2.0, %v493_v47 }
  0xf2   : > { %v1789_v58 = vsub.f32 %v621_v50, %v586_v51 }
  0xf3   : > { %v497_v48 = vpop.f32.mrb[2].mxu0  ;;  %v1793_v61 = vsub.f32 %v621_v50, %v587_v52 }
  0xf4   : > { %v499_v49 = vpop.f32.mrb[3].mxu0  ;;  %v588_v59 = vmul.f32 2.0, %v497_v48 }
  0xf5   : > { %v589_v62 = vmul.f32 2.0, %v499_v49  ;;  %v656_v49 = vpop.permute.xlu1 %655 }
  0xf6   : > { %v1801_v14 = vsub.f32 %v626_v63, %v588_v59  ;;  %v661_v59 = vpop.permute.xlu0 %660 }
  0xf7   : > { %v503_v54 = vpop.f32.mrb[4].mxu0  ;;  %v1805_v16 = vsub.f32 %v626_v63, %v589_v62 }
  0xf8   : > { %v590_v55 = vmul.f32 2.0, %v503_v54  ;;  %v505_v56 = vpop.f32.mrb[5].mxu0 }
  0xf9   : > { %v591_v57 = vmul.f32 2.0, %v505_v56 }
  0xfa   : > { %v1791_v60 = vsub.f32 %v631_v53, %v590_v55 }
  0xfb   : > { %v1795_v1 = vsub.f32 %v631_v53, %v591_v57  ;;  %v509_v2 = vpop.f32.mrb[6].mxu0 }
  0xfc   : > { %v730_v3 = vmin.f32 %v1789_v58, %v1791_v60  ;;  %v592_v7 = vmul.f32 2.0, %v509_v2  ;;  %v511_v9 = vpop.f32.mrb[7].mxu0 }
  0xfd   : > { %v751_v10 = vmin.f32 %v1793_v61, %v1795_v1  ;;  %v593_v12 = vmul.f32 2.0, %v511_v9 }
  0xfe   : > { %v1803_v15 = vsub.f32 %v636_v11, %v592_v7 }
  0xff   : > { %v1807_v17 = vsub.f32 %v636_v11, %v593_v12  ;;  %v515_v18 = vpop.f32.mrb[8].mxu0  ;;  %v666_v12 = vpop.permute.xlu1 %665 }
 0x100   : > { %v731_v19 = vmin.f32 %v1801_v14, %v1803_v15  ;;  %v594_v20 = vmul.f32 2.0, %v515_v18  ;;  %v517_v21 = vpop.f32.mrb[9].mxu0 }
 0x101   : > { %v752_v22 = vmin.f32 %v1805_v16, %v1807_v17  ;;  %v595_v24 = vmul.f32 2.0, %v517_v21 }
 0x102   : > { %v1813_v25 = vsub.f32 %v641_v23, %v594_v20 }
 0x103   : > { %v1815_v26 = vsub.f32 %v641_v23, %v595_v24  ;;  %v521_v27 = vpop.f32.mrb[10].mxu0 }
 0x104   : > { %v732_v28 = vmin.f32 %v730_v3, %v1813_v25  ;;  %v596_v29 = vmul.f32 2.0, %v521_v27  ;;  %v523_v30 = vpop.f32.mrb[11].mxu0 }
 0x105   : > { %v753_v32 = vmin.f32 %v751_v10, %v1815_v26  ;;  %v597_v33 = vmul.f32 2.0, %v523_v30 }
 0x106   : > { %v1819_v34 = vsub.f32 %v646_v31, %v596_v29 }
 0x107   : > { %v1821_v35 = vsub.f32 %v646_v31, %v597_v33  ;;  %v527_v36 = vpop.f32.mrb[12].mxu0 }
 0x108   : > { %v733_v37 = vmin.f32 %v731_v19, %v1819_v34  ;;  %v598_v38 = vmul.f32 2.0, %v527_v36  ;;  %v529_v39 = vpop.f32.mrb[13].mxu0 }
 0x109   : > { %v754_v41 = vmin.f32 %v752_v22, %v1821_v35  ;;  %v599_v42 = vmul.f32 2.0, %v529_v39  ;;  %v676_v39 = vpop.permute.xlu1 %675 }
 0x10a   : > { %v1825_v43 = vsub.f32 %v651_v40, %v598_v38 }
 0x10b   : > { %v1827_v44 = vsub.f32 %v651_v40, %v599_v42  ;;  %v533_v45 = vpop.f32.mrb[14].mxu0 }
 0x10c   : > { %v734_v46 = vmin.f32 %v732_v28, %v1825_v43  ;;  %v600_v47 = vmul.f32 2.0, %v533_v45  ;;  %v535_v48 = vpop.f32.mrb[15].mxu0  ;;  %v671_v28 = vpop.permute.xlu0 %670 }
 0x10d   : > { %v755_v50 = vmin.f32 %v753_v32, %v1827_v44  ;;  %v601_v51 = vmul.f32 2.0, %v535_v48 }
 0x10e   : > { %v1831_v52 = vsub.f32 %v656_v49, %v600_v47 }
 0x10f   : > { %v1833_v53 = vsub.f32 %v656_v49, %v601_v51  ;;  %v539_v54 = vpop.f32.mrb[16].mxu0 }
 0x110   : > { %v735_v55 = vmin.f32 %v733_v37, %v1831_v52  ;;  %v602_v56 = vmul.f32 2.0, %v539_v54  ;;  %v541_v57 = vpop.f32.mrb[17].mxu0 }
 0x111   : > { %v756_v62 = vmin.f32 %v754_v41, %v1833_v53  ;;  %v603_v63 = vmul.f32 2.0, %v541_v57 }
 0x112   : > { %v1837_v2 = vsub.f32 %v661_v59, %v602_v56 }
 0x113   : > { %v1839_v3 = vsub.f32 %v661_v59, %v603_v63  ;;  %v545_v7 = vpop.f32.mrb[18].mxu0 }
 0x114   : > { %v736_v9 = vmin.f32 %v734_v46, %v1837_v2  ;;  %v604_v10 = vmul.f32 2.0, %v545_v7  ;;  %v547_v11 = vpop.f32.mrb[19].mxu0  ;;  %v686_v7 = vpop.permute.xlu1 %685 }
 0x115   : > { %v757_v18 = vmin.f32 %v755_v50, %v1839_v3  ;;  %v605_v19 = vmul.f32 2.0, %v547_v11  ;;  %v681_v50 = vpop.permute.xlu0 %680 }
 0x116   : > { %v1843_v20 = vsub.f32 %v666_v12, %v604_v10 }
 0x117   : > { %v1845_v21 = vsub.f32 %v666_v12, %v605_v19  ;;  %v551_v22 = vpop.f32.mrb[20].mxu0 }
 0x118   : > { %v737_v23 = vmin.f32 %v735_v55, %v1843_v20  ;;  %v606_v24 = vmul.f32 2.0, %v551_v22  ;;  %v553_v27 = vpop.f32.mrb[21].mxu0 }
 0x119   : > { %v758_v29 = vmin.f32 %v756_v62, %v1845_v21  ;;  %v607_v30 = vmul.f32 2.0, %v553_v27 }
 0x11a   : > { %v1849_v31 = vsub.f32 %v671_v28, %v606_v24  ;;  %v691_v24 = vpop.permute.xlu0 %690 }
 0x11b   : > { %v1851_v32 = vsub.f32 %v671_v28, %v607_v30  ;;  %v557_v33 = vpop.f32.mrb[22].mxu0 }
 0x11c   : > { %v738_v36 = vmin.f32 %v736_v9, %v1849_v31  ;;  %v608_v37 = vmul.f32 2.0, %v557_v33  ;;  %v559_v38 = vpop.f32.mrb[23].mxu0 }
 0x11d   : > { %v759_v40 = vmin.f32 %v757_v18, %v1851_v32  ;;  %v609_v41 = vmul.f32 2.0, %v559_v38 }
 0x11e   : > { %v1855_v42 = vsub.f32 %v676_v39, %v608_v37 }
 0x11f   : > { %v1857_v45 = vsub.f32 %v676_v39, %v609_v41  ;;  %v563_v46 = vpop.f32.mrb[24].mxu0  ;;  %v696_v39 = vpop.permute.xlu1 %695 }
 0x120   : > { %v739_v47 = vmin.f32 %v737_v23, %v1855_v42  ;;  %v610_v48 = vmul.f32 2.0, %v563_v46  ;;  %v565_v49 = vpop.f32.mrb[25].mxu0 }
 0x121   : > { %v760_v51 = vmin.f32 %v758_v29, %v1857_v45  ;;  %v611_v54 = vmul.f32 2.0, %v565_v49 }
 0x122   : > { %v1861_v55 = vsub.f32 %v681_v50, %v610_v48 }
 0x123   : > { %v1863_v56 = vsub.f32 %v681_v50, %v611_v54  ;;  %v569_v57 = vpop.f32.mrb[26].mxu0 }
 0x124   : > { %v740_v59 = vmin.f32 %v738_v36, %v1861_v55  ;;  %v612_v62 = vmul.f32 2.0, %v569_v57  ;;  %v571_v63 = vpop.f32.mrb[27].mxu0  ;;  %v772_v57 = vlaneseq }
 0x125   : > { %v761_v9 = vmin.f32 %v759_v40, %v1863_v56  ;;  %v613_v10 = vmul.f32 2.0, %v571_v63 }
 0x126   : > { %v1867_v11 = vsub.f32 %v686_v7, %v612_v62 }
 0x127   : > { %v1869_v12 = vsub.f32 %v686_v7, %v613_v10  ;;  %v575_v18 = vpop.f32.mrb[28].mxu0  ;;  %v1886_v10 = vshrl.u32 %v772_v57, 7 }
 0x128   : > { %v741_v19 = vmin.f32 %v739_v47, %v1867_v11  ;;  %v614_v22 = vmul.f32 2.0, %v575_v18  ;;  %v577_v23 = vpop.f32.mrb[29].mxu0 }
 0x129   : > { %v762_v27 = vmin.f32 %v760_v51, %v1869_v12  ;;  %v615_v28 = vmul.f32 2.0, %v577_v23 }
 0x12a   : > { %v1873_v29 = vsub.f32 %v691_v24, %v614_v22 }
 0x12b   : > { %v1875_v30 = vsub.f32 %v691_v24, %v615_v28  ;;  %v581_v33 = vpop.f32.mrb[30].mxu0  ;;  %v1889_v24 = vadd.s32 8, %v1886_v10  ;;  %v1898_v28 = vadd.s32 32, %v1886_v10 }
 0x12c   : > { %v742_v36 = vmin.f32 %v740_v59, %v1873_v29  ;;  %v616_v37 = vmul.f32 2.0, %v581_v33  ;;  %v583_v38 = vpop.f32.mrb[31].mxu0  ;;  %v1901_v33 = vadd.s32 40, %v1886_v10 }
 0x12d   : > { %v763_v40 = vmin.f32 %v761_v9, %v1875_v30  ;;  %v617_v41 = vmul.f32 2.0, %v583_v38  ;;  %v1909_v38 = vadd.s32 56, %v1886_v10 }
 0x12e   : > { %v1879_v46 = vsub.f32 %v696_v39, %v616_v37 }
 0x12f   : > { %v1881_v47 = vsub.f32 %v696_v39, %v617_v41  ;;  %v1912_v39 = vadd.s32 64, %v1886_v10  ;;  %v1918_v41 = vadd.s32 80, %v1886_v10 }
 0x130   : > { %v743_v48 = vmin.f32 %v741_v19, %v1879_v46  ;;  %v1892_v19 = vadd.s32 16, %v1886_v10 }
 0x131   : > { %v764_v49 = vmin.f32 %v762_v27, %v1881_v47  ;;  %v1895_v27 = vadd.s32 24, %v1886_v10 }
 0x132   : > { %v744_v50 = vmin.f32 %v742_v36, %v743_v48  ;;  %v1904_v36 = vadd.s32 48, %v1886_v10  ;;  %v1921_v48 = vadd.s32 88, %v1886_v10 }
 0x133   : > { %v765_v51 = vmin.f32 %v763_v40, %v764_v49  ;;  %v1915_v40 = vadd.s32 72, %v1886_v10  ;;  %v1924_v49 = vadd.s32 96, %v1886_v10 }
 0x134   : > { %v745_v54 = vrot.slane %v744_v50, 4 }
 0x135   : > { %v766_v62 = vrot.slane %v765_v51, 4 }
 0x136   : > { %v746_v59 = vmin.f32 %v744_v50, %v745_v54  ;;  %v1962_v54 = vadd.s32 112, %v1886_v10 }
 0x137   : > { %v767_v63 = vmin.f32 %v765_v51, %v766_v62  ;;  %v1959_v51 = vadd.s32 104, %v1886_v10  ;;  %v1965_v62 = vadd.s32 120, %v1886_v10 }
 0x138   : > { %v747_v7 = vrot.slane %v746_v59, 2 }
 0x139   : > { %v768_v9 = vrot.slane %v767_v63, 2 }
 0x13a   : > { %v748_v18 = vmin.f32 %v746_v59, %v747_v7 }
 0x13b   : > { %v769_v22 = vmin.f32 %v767_v63, %v768_v9 }
 0x13c   : > { %v749_v23 = vrot.slane %v748_v18, 1 }
 0x13d   : > { %v770_v50 = vrot.slane %v769_v22, 1 }
 0x13e   : > { %v1906_v37 = vmin.f32 %v748_v18, %v749_v23 }
 0x13f   : > { %v1967_v59 = vmin.f32 %v769_v22, %v770_v50 }
 0x140   : > { %vm789_vm1 = vcmp.eq.f32.partialorder %v1789_v58, %v1906_v37  ;;  %vm791_vm2 = vcmp.eq.f32.partialorder %v1801_v14, %v1906_v37  ;;  %vm793_vm3 = vcmp.eq.f32.partialorder %v1791_v60, %v1906_v37  ;;  %vm795_vm4 = vcmp.eq.f32.partialorder %v1803_v15, %v1906_v37 }
 0x141   : > { %vm797_vm5 = vcmp.eq.f32.partialorder %v1813_v25, %v1906_v37  ;;  %vm799_vm6 = vcmp.eq.f32.partialorder %v1819_v34, %v1906_v37  ;;  %vm801_vm7 = vcmp.eq.f32.partialorder %v1825_v43, %v1906_v37  ;;  %vm803_vm8 = vcmp.eq.f32.partialorder %v1831_v52, %v1906_v37 }
 0x142   : > { %vm805_vm9 = vcmp.eq.f32.partialorder %v1837_v2, %v1906_v37  ;;  %vm807_vm10 = vcmp.eq.f32.partialorder %v1843_v20, %v1906_v37  ;;  %vm809_vm11 = vcmp.eq.f32.partialorder %v1849_v31, %v1906_v37  ;;  %vm811_vm12 = vcmp.eq.f32.partialorder %v1855_v42, %v1906_v37 }
 0x143   : > { %vm813_vm13 = vcmp.eq.f32.partialorder %v1861_v55, %v1906_v37  ;;  %vm815_vm14 = vcmp.eq.f32.partialorder %v1867_v11, %v1906_v37  ;;  %vm817_vm15 = vcmp.eq.f32.partialorder %v1873_v29, %v1906_v37  ;;  %vm819_vm0 = vcmp.eq.f32.partialorder %v1879_v46, %v1906_v37 }
 0x144   : > { %v821_v63 = vsel %vm789_vm1, %v1886_v10, 128  ;;  %v823_v7 = vsel %vm791_vm2, %v1889_v24, 128  ;;  %v825_v9 = vsel %vm793_vm3, %v1892_v19, 128  ;;  %v827_v18 = vsel %vm795_vm4, %v1895_v27, 128 }
 0x145   : > { %v829_v58 = vsel %vm797_vm5, %v1898_v28, 128  ;;  %v831_v14 = vsel %vm799_vm6, %v1901_v33, 128  ;;  %v833_v60 = vsel %vm801_vm7, %v1904_v36, 128  ;;  %v835_v15 = vsel %vm803_vm8, %v1909_v38, 128 }
 0x146   : > { %v837_v25 = vsel %vm805_vm9, %v1912_v39, 128  ;;  %v839_v34 = vsel %vm807_vm10, %v1915_v40, 128  ;;  %v841_v43 = vsel %vm809_vm11, %v1918_v41, 128  ;;  %v843_v52 = vsel %vm811_vm12, %v1921_v48, 128 }
 0x147   : > { %vm853_vm1 = vcmp.lt.s32.totalorder %v821_v63, %v825_v9  ;;  %vm855_vm2 = vcmp.lt.s32.totalorder %v823_v7, %v827_v18  ;;  %vm790_vm3 = vcmp.eq.f32.partialorder %v1793_v61, %v1967_v59  ;;  %vm792_vm4 = vcmp.eq.f32.partialorder %v1805_v16, %v1967_v59 }
 0x148   : > { %v854_v2 = vsel %vm853_vm1, %v821_v63, %v825_v9  ;;  %v856_v20 = vsel %vm855_vm2, %v823_v7, %v827_v18  ;;  %vm806_vm6 = vcmp.eq.f32.partialorder %v1839_v3, %v1967_v59  ;;  %vm814_vm12 = vcmp.eq.f32.partialorder %v1863_v56, %v1967_v59 }
 0x149   : > { %vm857_vm7 = vcmp.lt.s32.totalorder %v854_v2, %v829_v58  ;;  %vm859_vm8 = vcmp.lt.s32.totalorder %v856_v20, %v831_v14  ;;  %vm816_vm9 = vcmp.eq.f32.partialorder %v1869_v12, %v1967_v59  ;;  %v845_v7 = vsel %vm813_vm13, %v1924_v49, 128 }
 0x14a   : > { %v858_v31 = vsel %vm857_vm7, %v854_v2, %v829_v58  ;;  %v860_v42 = vsel %vm859_vm8, %v856_v20, %v831_v14  ;;  %vm812_vm8 = vcmp.eq.f32.partialorder %v1857_v45, %v1967_v59  ;;  %v847_v9 = vsel %vm815_vm14, %v1959_v51, 128 }
 0x14b   : > { %vm861_vm1 = vcmp.lt.s32.totalorder %v858_v31, %v833_v60  ;;  %vm863_vm2 = vcmp.lt.s32.totalorder %v860_v42, %v835_v15  ;;  %v849_v14 = vsel %vm817_vm15, %v1962_v54, 128  ;;  %v822_v11 = vsel %vm790_vm3, %v1886_v10, 128 }
 0x14c   : > { %v862_v22 = vsel %vm861_vm1, %v858_v31, %v833_v60  ;;  %v864_v23 = vsel %vm863_vm2, %v860_v42, %v835_v15  ;;  %vm818_vm1 = vcmp.eq.f32.partialorder %v1875_v30, %v1967_v59  ;;  %vm820_vm2 = vcmp.eq.f32.partialorder %v1881_v47, %v1967_v59 }
 0x14d   : > { %vm865_vm11 = vcmp.lt.s32.totalorder %v862_v22, %v837_v25  ;;  %vm867_vm10 = vcmp.lt.s32.totalorder %v864_v23, %v839_v34  ;;  %v851_v60 = vsel %vm819_vm0, %v1965_v62, 128  ;;  %v824_v29 = vsel %vm792_vm4, %v1889_v24, 128 }
 0x14e   : > { %v866_v50 = vsel %vm865_vm11, %v862_v22, %v837_v25  ;;  %v868_v63 = vsel %vm867_vm10, %v864_v23, %v839_v34  ;;  %vm2296_vm15 = vcmp.eq.f32.partialorder %v1795_v1, %v1967_v59  ;;  %vm2297_vm0 = vcmp.eq.f32.partialorder %v1807_v17, %v1967_v59 }
 0x14f   : > { %vm869_vm7 = vcmp.lt.s32.totalorder %v866_v50, %v841_v43  ;;  %vm871_vm5 = vcmp.lt.s32.totalorder %v868_v63, %v843_v52  ;;  %v826_v46 = vsel %vm2296_vm15, %v1892_v19, 128  ;;  %v828_v37 = vsel %vm2297_vm0, %v1895_v27, 128 }
 0x150   : > { %v870_v18 = vsel %vm869_vm7, %v866_v50, %v841_v43  ;;  %v872_v58 = vsel %vm871_vm5, %v868_v63, %v843_v52  ;;  %vm2298_vm4 = vcmp.eq.f32.partialorder %v1815_v26, %v1967_v59  ;;  %vm892_vm5 = vcmp.lt.s32.totalorder %v822_v11, %v826_v46 }
 0x151   : > { %vm873_vm10 = vcmp.lt.s32.totalorder %v870_v18, %v845_v7  ;;  %vm875_vm11 = vcmp.lt.s32.totalorder %v872_v58, %v847_v9  ;;  %v830_v16 = vsel %vm2298_vm4, %v1898_v28, 128  ;;  %vm894_vm7 = vcmp.lt.s32.totalorder %v824_v29, %v828_v37 }
 0x152   : > { %v874_v55 = vsel %vm873_vm10, %v870_v18, %v845_v7  ;;  %v876_v15 = vsel %vm875_vm11, %v872_v58, %v847_v9  ;;  %vm2299_vm10 = vcmp.eq.f32.partialorder %v1821_v35, %v1967_v59  ;;  %v893_v52 = vsel %vm892_vm5, %v822_v11, %v826_v46 }
 0x153   : > { %vm877_vm13 = vcmp.lt.s32.totalorder %v874_v55, %v849_v14  ;;  %vm879_vm14 = vcmp.lt.s32.totalorder %v876_v15, %v851_v60  ;;  %v832_v1 = vsel %vm2299_vm10, %v1901_v33, 128  ;;  %v895_v17 = vsel %vm894_vm7, %v824_v29, %v828_v37 }
 0x154   : > { %v878_v25 = vsel %vm877_vm13, %v874_v55, %v849_v14  ;;  %v880_v61 = vsel %vm879_vm14, %v876_v15, %v851_v60  ;;  %vm2300_vm11 = vcmp.eq.f32.partialorder %v1827_v44, %v1967_v59  ;;  %vm896_vm13 = vcmp.lt.s32.totalorder %v893_v52, %v830_v16 }
 0x155   : > { %vm881_vm3 = vcmp.lt.s32.totalorder %v878_v25, %v880_v61  ;;  %v834_v2 = vsel %vm2300_vm11, %v1904_v36, 128  ;;  %vm898_vm14 = vcmp.lt.s32.totalorder %v895_v17, %v832_v1  ;;  %vm2301_vm0 = vcmp.eq.f32.partialorder %v1833_v53, %v1967_v59 }
 0x156   : > { %v882_v34 = vsel %vm881_vm3, %v878_v25, %v880_v61  ;;  %v836_v26 = vsel %vm2301_vm0, %v1909_v38, 128  ;;  %v897_v20 = vsel %vm896_vm13, %v893_v52, %v830_v16  ;;  %v899_v31 = vsel %vm898_vm14, %v895_v17, %v832_v1 }
 0x157   : > { %v883_v43 = vrot.slane %v882_v34, 4  ;;  %vm900_vm3 = vcmp.lt.s32.totalorder %v897_v20, %v834_v2  ;;  %vm902_vm4 = vcmp.lt.s32.totalorder %v899_v31, %v836_v26  ;;  %v838_v35 = vsel %vm806_vm6, %v1912_v39, 128 }
 0x158   : > { %vm2302_vm5 = vcmp.eq.f32.partialorder %v1845_v21, %v1967_v59  ;;  %v901_v22 = vsel %vm900_vm3, %v897_v20, %v834_v2  ;;  %v903_v23 = vsel %vm902_vm4, %v899_v31, %v836_v26  ;;  %vm2303_vm7 = vcmp.eq.f32.partialorder %v1851_v32, %v1967_v59 }
 0x159   : > { %vm884_vm15 = vcmp.lt.s32.totalorder %v882_v34, %v883_v43  ;;  %v840_v44 = vsel %vm2302_vm5, %v1915_v40, 128  ;;  %v842_v53 = vsel %vm2303_vm7, %v1918_v41, 128  ;;  %vm904_vm10 = vcmp.lt.s32.totalorder %v901_v22, %v838_v35 }
 0x15a   : > { %v885_v42 = vsel %vm884_vm15, %v882_v34, %v883_v43  ;;  %vm906_vm11 = vcmp.lt.s32.totalorder %v903_v23, %v840_v44  ;;  %v844_v3 = vsel %vm812_vm8, %v1921_v48, 128  ;;  %v905_v63 = vsel %vm904_vm10, %v901_v22, %v838_v35  ;;  %v1544_v22 = vld [vmem:[%s1637_s28 + $0x30] sm:$0xff] }
 0x15b   : > { %v886_v50 = vrot.slane %v885_v42, 2  ;;  %v907_v7 = vsel %vm906_vm11, %v903_v23, %v840_v44  ;;  %vm908_vm6 = vcmp.lt.s32.totalorder %v905_v63, %v842_v53  ;;  %v846_v21 = vsel %vm814_vm12, %v1924_v49, 128 }
 0x15c   : > { %vm910_vm13 = vcmp.lt.s32.totalorder %v907_v7, %v844_v3  ;;  %v848_v32 = vsel %vm816_vm9, %v1959_v51, 128  ;;  %v909_v9 = vsel %vm908_vm6, %v905_v63, %v842_v53  ;;  %v850_v45 = vsel %vm818_vm1, %v1962_v54, 128 }
 0x15d   : > { %v911_v18 = vsel %vm910_vm13, %v907_v7, %v844_v3  ;;  %vm912_vm8 = vcmp.lt.s32.totalorder %v909_v9, %v846_v21  ;;  %vm887_vm15 = vcmp.lt.s32.totalorder %v885_v42, %v886_v50  ;;  %v852_v56 = vsel %vm820_vm2, %v1965_v62, 128  ;;  %v1545_v3 = vld [vmem:[%s1637_s28 + $0x38] sm:$0xff] }
 0x15e   : > { %vm914_vm14 = vcmp.lt.s32.totalorder %v911_v18, %v848_v32  ;;  %v913_v58 = vsel %vm912_vm8, %v909_v9, %v846_v21  ;;  %v888_v55 = vsel %vm887_vm15, %v885_v42, %v886_v50  ;;  %v1572_v37 = vmov 1966171168  }
 0x15f   : > { %v915_v14 = vsel %vm914_vm14, %v911_v18, %v848_v32  ;;  %vm916_vm12 = vcmp.lt.s32.totalorder %v913_v58, %v850_v45  ;;  %v889_v30 = vrot.slane %v888_v55, 1  ;;  %v1126_v25 = vunpack.c.l.s4 %v1572_v37 }
 0x160   : > { %vm918_vm0 = vcmp.lt.s32.totalorder %v915_v14, %v852_v56  ;;  %v917_v12 = vsel %vm916_vm12, %v913_v58, %v850_v45  ;;  %v1573_v43 = vmov 1.0|1.0  }
 0x161   : > { %v919_v60 = vsel %vm918_vm0, %v915_v14, %v852_v56  ;;  %vm890_vm3 = vcmp.lt.s32.totalorder %v888_v55, %v889_v30  ;;  %v1127_v34 = vunpack.c.0.s8 %v1126_v25 }
 0x162   : > { %vm920_vm9 = vcmp.lt.s32.totalorder %v917_v12, %v919_v60  ;;  %v2129_v59 = vsel %vm890_vm3, %v888_v55, %v889_v30 }
 0x163   : > { %v921_v15 = vsel %vm920_vm9, %v917_v12, %v919_v60  ;;  %vm931_vm5 = vcmp.eq.s32.totalorder %v1886_v10, %v2129_v59  ;;  %vm933_vm7 = vcmp.eq.s32.totalorder %v1889_v24, %v2129_v59  ;;  %v2147_v1 = vsub.s32 %v1127_v34, %v1886_v10 }
 0x164   : > { %v922_v11 = vrot.slane %v921_v15, 4  ;;  %vm1483_vm14 = vmpackc.low %vm933_vm7, %vm931_vm5  ;;  %vm935_vm12 = vcmp.eq.s32.totalorder %v1892_v19, %v2129_v59  ;;  %vm937_vm0 = vcmp.eq.s32.totalorder %v1895_v27, %v2129_v59  ;;  %vm941_vm5 = vcmp.eq.s32.totalorder %v1901_v33, %v2129_v59 }
 0x165   : > { %vm1487_vm3 = vmpackc.low %vm937_vm0, %vm935_vm12  ;;  %vm2174_vm7 = vcmp.lt.s32.totalorder %v772_v57, 256  ;;  %v356_v57 = vld [vmem:[%s2291_s2] sm:$0xff] }
 0x166   : > { %vm923_vm1 = vcmp.lt.s32.totalorder %v921_v15, %v922_v11 }
 0x167   : > { %v924_v29 = vsel %vm923_vm1, %v921_v15, %v922_v11 }
 0x168   : > { %v925_v46 = vrot.slane %v924_v29, 2 }
 0x16a   : > { %vm926_vm4 = vcmp.lt.s32.totalorder %v924_v29, %v925_v46 }
 0x16b   : > { %v927_v47 = vsel %vm926_vm4, %v924_v29, %v925_v46 }
 0x16c   : > { %v928_v61 = vrot.slane %v927_v47, 1 }
 0x16e   : > { %vm929_vm2 = vcmp.lt.s32.totalorder %v927_v47, %v928_v61 }
 0x16f   : > { %v2131_v16 = vsel %vm929_vm2, %v927_v47, %v928_v61  ;;  %vm939_vm2 = vcmp.eq.s32.totalorder %v1898_v28, %v2129_v59 }
 0x170   : > { %vm932_vm10 = vcmp.eq.s32.totalorder %v1886_v10, %v2131_v16  ;;  %vm934_vm11 = vcmp.eq.s32.totalorder %v1889_v24, %v2131_v16  ;;  %vm936_vm6 = vcmp.eq.s32.totalorder %v1892_v19, %v2131_v16  ;;  %vm938_vm13 = vcmp.eq.s32.totalorder %v1895_v27, %v2131_v16 }
 0x171   : > { %vm1481_vm8 = vmpackc.low %vm934_vm11, %vm932_vm10  ;;  %vm940_vm9 = vcmp.eq.s32.totalorder %v1898_v28, %v2131_v16  ;;  %vm942_vm1 = vcmp.eq.s32.totalorder %v1901_v33, %v2131_v16  ;;  %v1124_v10 = vcombine.low %v2129_v59, %v2131_v16  ;;  %vm944_vm10 = vcmp.eq.s32.totalorder %v1904_v36, %v2131_v16  ;;  %v357_v28 = vld [vmem:[%s2291_s2 + $0x8] sm:$0xff]  ;;  %v358_v33 = vld [vmem:[%s2291_s2 + $0x10] sm:$0xff] }
 0x172   : > { %1482 = vmatprep.subr.msk.bf16.mxu1 %vm1481_vm8, %v1573_v43  ;;  %vm1485_vm15 = vmpackc.low %vm938_vm13, %vm936_vm6  ;;  %vm946_vm11 = vcmp.eq.s32.totalorder %v1909_v38, %v2131_v16  ;;  %vm943_vm8 = vcmp.eq.s32.totalorder %v1904_v36, %v2129_v59  ;;  %vm950_vm12 = vcmp.eq.s32.totalorder %v1915_v40, %v2131_v16  ;;  %v359_v36 = vld [vmem:[%s2291_s2 + $0x18] sm:$0xff] }
 0x173   : > { %1484 = vmatpush1.bf16.msk.msra.mxu1 %vm1483_vm14, %v1573_v43  ;;  %v1131_v24 = vrot.slane %v1124_v10, %v2147_v1  ;;  %vm1489_vm4 = vmpackc.low %vm942_vm1, %vm940_vm9  ;;  %vm945_vm14 = vcmp.eq.s32.totalorder %v1909_v38, %v2129_v59  ;;  %vm947_vm1 = vcmp.eq.s32.totalorder %v1912_v39, %v2129_v59 }
 0x174   : > { %1486 = vmatprep.subr.msk.bf16.mxu1 %vm1485_vm15, %v1573_v43  ;;  %vm1491_vm6 = vmpackc.low %vm941_vm5, %vm939_vm2  ;;  %vm948_vm15 = vcmp.eq.s32.totalorder %v1912_v39, %v2131_v16  ;;  %vm954_vm2 = vcmp.eq.s32.totalorder %v1921_v48, %v2131_v16 }
 0x175   : > { %v1138_v27 = vrot.slane %v1131_v24, %v2147_v1  ;;  %vm1493_vm13 = vmpackc.low %vm946_vm11, %vm944_vm10  ;;  %vm951_vm11 = vcmp.eq.s32.totalorder %v1918_v41, %v2129_v59 }
 0x176   : > { %vm1495_vm0 = vmpackc.low %vm945_vm14, %vm943_vm8  ;;  %vm958_vm8 = vcmp.eq.s32.totalorder %v1959_v51, %v2131_v16 }
 0x177   : > { %1488 = vmatpush1.bf16.msk.msra.mxu1 %vm1487_vm3, %v1573_v43  ;;  %1143 = vst.msk [vmem:[%s323_s18] sm:$0x3] %vm2174_vm7, %v1138_v27  ;;  %vm1497_vm9 = vmpackc.low %vm950_vm12, %vm948_vm15  ;;  %vm949_vm3 = vcmp.eq.s32.totalorder %v1915_v40, %v2129_v59  ;;  %vm955_vm12 = vcmp.eq.s32.totalorder %v1924_v49, %v2129_v59 }
 0x178   : > { %1490 = vmatprep.subr.msk.bf16.mxu1 %vm1489_vm4, %v1573_v43  ;;  %vm952_vm4 = vcmp.eq.s32.totalorder %v1918_v41, %v2131_v16  ;;  %vm1499_vm5 = vmpackc.low %vm949_vm3, %vm947_vm1  ;;  %vm962_vm1 = vcmp.eq.s32.totalorder %v1965_v62, %v2131_v16 }
 0x179   : > { %vm1501_vm10 = vmpackc.low %vm954_vm2, %vm952_vm4  ;;  %vm959_vm2 = vcmp.eq.s32.totalorder %v1962_v54, %v2129_v59 }
 0x17b   : > { %1492 = vmatpush1.bf16.msk.msra.mxu1 %vm1491_vm6, %v1573_v43  ;;  %vm953_vm6 = vcmp.eq.s32.totalorder %v1921_v48, %v2129_v59 }
 0x17c   : > { %1494 = vmatprep.subr.msk.bf16.mxu1 %vm1493_vm13, %v1573_v43  ;;  %vm956_vm13 = vcmp.eq.s32.totalorder %v1924_v49, %v2131_v16  ;;  %vm1503_vm14 = vmpackc.low %vm953_vm6, %vm951_vm11 }
 0x17d   : > { %vm1505_vm15 = vmpackc.low %vm958_vm8, %vm956_vm13 }
 0x17f   : > { %1496 = vmatpush1.bf16.msk.msra.mxu1 %vm1495_vm0, %v1573_v43  ;;  %vm957_vm0 = vcmp.eq.s32.totalorder %v1959_v51, %v2129_v59 }
 0x180   : > { %1498 = vmatprep.subr.msk.bf16.mxu1 %vm1497_vm9, %v1573_v43  ;;  %vm960_vm9 = vcmp.eq.s32.totalorder %v1962_v54, %v2131_v16  ;;  %vm1507_vm3 = vmpackc.low %vm957_vm0, %vm955_vm12 }
 0x181   : > { %vm1509_vm4 = vmpackc.low %vm962_vm1, %vm960_vm9 }
 0x183   : > { %1500 = vmatpush1.bf16.msk.msra.mxu1 %vm1499_vm5, %v1573_v43  ;;  %vm961_vm5 = vcmp.eq.s32.totalorder %v1965_v62, %v2129_v59 }
 0x184   : > { %1502 = vmatprep.subr.msk.bf16.mxu1 %vm1501_vm10, %v1573_v43  ;;  %vm1511_vm10 = vmpackc.low %vm961_vm5, %vm959_vm2 }
 0x187   : > { %1504 = vmatpush1.bf16.msk.msra.mxu1 %vm1503_vm14, %v1573_v43 }
 0x188   : > { %1506 = vmatprep.subr.msk.bf16.mxu1 %vm1505_vm15, %v1573_v43 }
 0x18b   : > { %1508 = vmatpush1.bf16.msk.msra.mxu1 %vm1507_vm3, %v1573_v43 }
 0x18c   : > { %1510 = vmatprep.subr.msk.bf16.mxu1 %vm1509_vm4, %v1573_v43 }
 0x18f   : > { %1512 = vmatpush1.bf16.msk.msra.mxu1 %vm1511_vm10, %v1573_v43 }
 0x192   : > { %1092 = vmatmul.mubr.f32.vlgmr.msra.gmra.mrb[0].mxu1 %v356_v57 }
 0x193   : > { %1097 = vmatprep.mubr.f32.mxu1 %v1570_v0 }
 0x196   : > { %1098 = vmatmul.mubr.f32.gmra.mrb[2].mxu1 %v357_v28 }
 0x197   : > { %1103 = vmatprep.mubr.f32.mxu1 %v1570_v0 }
 0x19a   : > { %1104 = vmatmul.mubr.f32.gmra.mrb[4].mxu1 %v358_v33 }
 0x19b   : > { %1109 = vmatprep.mubr.f32.mxu1 %v1570_v0 }
 0x19e   : > { %1110 = vmatmul.mubr.f32.gmra.mrb[6].mxu1 %v359_v36 }
 0x265   : > { %v1093_v38 = vpop.f32.mrb[0].mxu1 }
 0x266   : > { %1116 = vst [vmem:[%s2253_s11] sm:$0xff] %v1093_v38  ;;  %v1095_v39 = vpop.f32.mrb[1].mxu1  ;;  %v1144_v0 = vsub.f32 %v1093_v38, %v1652_v6 }
 0x267   : > { %1117 = vst [vmem:[%s2253_s11 + $0x8] sm:$0xff] %v1095_v39  ;;  %v1145_v40 = vsub.f32 %v1095_v39, %v1646_v4 }
 0x268   : > { %v1152_v54 = vmul.f32 %v1144_v0, %v1144_v0 }
 0x269   : > { %v1099_v41 = vpop.f32.mrb[2].mxu1  ;;  %v1153_v52 = vmul.f32 %v1145_v40, %v1145_v40 }
 0x26a   : > { %1118 = vst [vmem:[%s2253_s11 + $0x10] sm:$0xff] %v1099_v41  ;;  %v1146_v48 = vsub.f32 %v1099_v41, %v1657_v8  ;;  %v1101_v49 = vpop.f32.mrb[3].mxu1  ;;  %v1543_v8 = vld [vmem:[%s1637_s28 + $0x28] sm:$0xff] }
 0x26b   : > { %1119 = vst [vmem:[%s2253_s11 + $0x18] sm:$0xff] %v1101_v49  ;;  %v1147_v51 = vsub.f32 %v1101_v49, %v1649_v5 }
 0x26c   : > { %v1154_v62 = vmul.f32 %v1146_v48, %v1146_v48 }
 0x26d   : > { %v1155_v17 = vmul.f32 %v1147_v51, %v1147_v51  ;;  %v1105_v2 = vpop.f32.mrb[4].mxu1 }
 0x26e   : > { %v1160_v6 = vadd.f32 %v1154_v62, %v1152_v54  ;;  %1120 = vst [vmem:[%s2253_s11 + $0x20] sm:$0xff] %v1105_v2  ;;  %v1148_v4 = vsub.f32 %v1105_v2, %v1664_v13  ;;  %v1107_v26 = vpop.f32.mrb[5].mxu1 }
 0x26f   : > { %v1169_v20 = vadd.f32 %v1155_v17, %v1153_v52  ;;  %1121 = vst [vmem:[%s2253_s11 + $0x28] sm:$0xff] %v1107_v26  ;;  %v1149_v31 = vsub.f32 %v1107_v26, %v1543_v8 }
 0x270   : > { %v1156_v42 = vmul.f32 %v1148_v4, %v1148_v4 }
 0x271   : > { %v1157_v5 = vmul.f32 %v1149_v31, %v1149_v31  ;;  %v1111_v35 = vpop.f32.mrb[6].mxu1 }
 0x272   : > { %v1161_v44 = vadd.f32 %v1160_v6, %v1156_v42  ;;  %1122 = vst [vmem:[%s2253_s11 + $0x30] sm:$0xff] %v1111_v35  ;;  %v1150_v23 = vsub.f32 %v1111_v35, %v1544_v22  ;;  %v1113_v53 = vpop.f32.mrb[7].mxu1 }
 0x273   : > { %v1170_v50 = vadd.f32 %v1169_v20, %v1157_v5  ;;  %1123 = vst [vmem:[%s2253_s11 + $0x38] sm:$0xff] %v1113_v53  ;;  %v1151_v63 = vsub.f32 %v1113_v53, %v1545_v3 }
 0x274   : > { %v1158_v7 = vmul.f32 %v1150_v23, %v1150_v23 }
 0x275   : > { %v1159_v13 = vmul.f32 %v1151_v63, %v1151_v63 }
 0x276   : > { %v1162_v21 = vadd.f32 %v1161_v44, %v1158_v7 }
 0x277   : > { %v1171_v32 = vadd.f32 %v1170_v50, %v1159_v13 }
 0x278   : > { %v1163_v9 = vrot.slane %v1162_v21, 4 }
 0x279   : > { %v1172_v18 = vrot.slane %v1171_v32, 4 }
 0x27a   : > { %v1164_v45 = vadd.f32 %v1163_v9, %v1162_v21 }
 0x27b   : > { %v1173_v56 = vadd.f32 %v1172_v18, %v1171_v32 }
 0x27c   : > { %v1165_v58 = vrot.slane %v1164_v45, 2 }
 0x27d   : > { %v1174_v14 = vrot.slane %v1173_v56, 2 }
 0x27e   : > { %v1166_v12 = vadd.f32 %v1165_v58, %v1164_v45 }
 0x27f   : > { %v1175_v60 = vadd.f32 %v1174_v14, %v1173_v56 }
 0x280   : > { %v1167_v55 = vrot.slane %v1166_v12, 1 }
 0x281   : > { %v1176_v15 = vrot.slane %v1175_v60, 1 }
 0x282   : > { %v1168_v11 = vadd.f32 %v1167_v55, %v1166_v12 }
 0x283   : > { %v1177_v30 = vadd.f32 %v1176_v15, %v1175_v60 }
 0x285   : > { %v1180_v29 = vcombine.low %v1168_v11, %v1177_v30 }
 0x287   : > { %v1187_v46 = vrot.slane %v1180_v29, %v2147_v1 }
 0x289   : > { %v1194_v37 = vrot.slane %v1187_v46, %v2147_v1 }
 0x28b   : > { %1196 = vst.msk [vmem:[%s331_s12] sm:$0x3] %vm2174_vm7, %v1194_v37 }
 0x28c PF: > { %s17_s23 = sadd.s32 1, %s1568_s23   ;;  %s2306_s21 = smov %s1564_s22 }
 0x28d   : > { %p14_p5 = scmp.ge.s32.totalorder %s17_s23, 4   ;;  %s2307_s22 = smov %s2309_s24 }
 0x28f   :  { %16 = sbr.rel (!%p14_p5) target bundleno = 2 (0x2), region = 90 }

</bundles_post_ra>
